<compile_context>
chip_gen: v7x
topology: tpu7x:2x2x1
jax: 0.10.0
libtpu: 0.0.40
codegen_flags: <defaults>
</compile_context>

<pallas_src>
import functools

import jax
import jax.numpy as jnp
from jax.experimental import pallas as pl
from jax.experimental.pallas import tpu as pltpu


def _round_up(a, b):
    return ((a + b - 1) // b) * b


def _vmem_capacity_bytes():
    try:
        return int(pltpu.get_tpu_info().vmem_capacity_bytes)
    except Exception:
        return 64 * 2**20  # conservative default (v7x-sized VMEM)


def _spatio_conv_kernel(a_ref, xw_ref, b_ref, o_ref):
    # a_ref : (tm, Npad)  bf16   -- row tile of normalized adjacency A[dst, src]
    # xw_ref: (Npad, Lpad) bf16  -- (x @ W) fused over time, grid-invariant
    # b_ref : (1, Lpad)   f32    -- per-(t, c_out) bias, grid-invariant
    # o_ref : (tm, Lpad)  f32    -- lane-dense output tile
    acc = jnp.dot(a_ref[...], xw_ref[...], preferred_element_type=jnp.float32)
    o_ref[...] = jnp.maximum(acc + b_ref[...], 0.0).astype(o_ref.dtype)


def _make_call(resident_mode, *, tm, n_pad, l_pad, grid, vmem_limit, cost):
    """Build the pallas_call; `resident_mode` controls buffering of the
    grid-invariant inputs (pl.Buffered(1) to avoid useless double-buffering)."""
    def resident_spec(shape):
        if resident_mode is None:
            return pl.BlockSpec(shape, lambda i: (0, 0))
        return pl.BlockSpec(shape, lambda i: (0, 0), pipeline_mode=resident_mode)

    return pl.pallas_call(
        _spatio_conv_kernel,
        out_shape=jax.ShapeDtypeStruct((n_pad, l_pad), jnp.float32),
        grid_spec=pltpu.PrefetchScalarGridSpec(
            num_scalar_prefetch=0,
            grid=grid,
            in_specs=[
                pl.BlockSpec((tm, n_pad), lambda i: (i, 0)),   # A row tile (streamed)
                resident_spec((n_pad, l_pad)),                 # xw (resident)
                resident_spec((1, l_pad)),                     # bias (resident)
            ],
            out_specs=pl.BlockSpec((tm, l_pad), lambda i: (i, 0)),  # lane-dense out
        ),
        compiler_params=pltpu.CompilerParams(
            dimension_semantics=("parallel",),
            vmem_limit_bytes=vmem_limit,
        ),
        cost_estimate=cost,
    )


def spatio_conv_layer(x, edge_index, edge_attr, params,
                      compute_dtype=jnp.bfloat16):
    """x: (T, N, C_in) f32; edge_index: (2, E) i32; edge_attr: (E, F) f32."""
    T, N, c_in = x.shape
    c_out = params["gcn_weight"].shape[1]

    # ---- tiny / irregular glue: edge weights, degree norm, dense adjacency ----
    w_edge = edge_attr @ params["e_weight"].T + params["e_bias"]          # (E, 1)
    src, dst = edge_index[0], edge_index[1]
    deg = jnp.zeros((N,), jnp.float32).at[src].add(1.0)                   # degree(edge_index[0])
    sqrt_deg = jnp.sqrt(deg)
    ew = (sqrt_deg[src] * sqrt_deg[dst]).reshape(-1, 1) * w_edge          # (E, 1)
    adj = jnp.zeros((N, N), jnp.float32).at[dst, src].add(ew.reshape(-1)) # A[dst, src]
    # TODO(synk): for large genuinely-sparse graphs (E << N^2) replace the dense
    # adjacency with a PrefetchScalarGridSpec CSR gather over per-row-tile edge
    # offsets instead of streaming O(N^2) mostly-zero bytes.

    # ---- feature transform in the wrapper (tiny GEMM), time-fused layout ----
    # Avoids the kron(I_T, W) block-diagonal GEMM entirely: the kernel is a
    # single relu(A @ xw + b) with a lane-dense (N, T*Cout) output.
    xw = jnp.einsum("tnc,cd->tnd", x.astype(jnp.float32),
                    params["gcn_weight"].astype(jnp.float32))             # (T, N, Cout)
    xw = jnp.transpose(xw, (1, 0, 2)).reshape(N, T * c_out)               # (N, T*Cout)
    bias = jnp.tile(params["gcn_bias"].astype(jnp.float32), T).reshape(1, T * c_out)

    # ---- padding for lane-dense stores and uniform row tiling ----
    L = T * c_out
    l_pad = _round_up(L, 128)                       # unmasked vst on the store path

    vmem_cap = _vmem_capacity_bytes()
    if N <= 128:
        tm = _round_up(N, 8)                        # single step, tiny graphs
    elif N <= 512:
        # >= 2 row tiles so v7x's two TensorCores both get work (harmless on 1-TC).
        tm = max(128, _round_up(pl.cdiv(N, 2), 8))
    else:
        # Pipelined bounded-VMEM path; 512-row tiles only where VMEM allows (v6e/v5e
        # with raised limit), 256 on 64 MiB parts (v7x).
        tm = 512 if vmem_cap >= 96 * 2**20 else 256
    n_pad = _round_up(N, tm)
    grid = (n_pad // tm,)
    # TODO(synk): for very large N*T*Cout that cannot fit the resident xw in VMEM,
    # add a trailing "arbitrary" grid axis K-tiling the contraction dim of A with
    # an f32 VMEM accumulator (pl.when init/finalize).

    adj_p = jnp.pad(adj.astype(compute_dtype), ((0, n_pad - N), (0, n_pad - N)))
    xw_p = jnp.pad(xw.astype(compute_dtype), ((0, n_pad - N), (0, l_pad - L)))
    bias_p = jnp.pad(bias, ((0, 0), (0, l_pad - L)))

    # VMEM budget: streamed A tile + out tile double-buffered, xw/bias counted
    # conservatively at 2 buffers (Buffered(1) only reclaims it).
    resident_bytes = (2 * tm * n_pad * 2            # A row tile (bf16, x2 buffers)
                      + 2 * n_pad * l_pad * 2       # xw (bf16)
                      + 2 * l_pad * 4               # bias (f32)
                      + 2 * tm * l_pad * 4)         # output tile (f32, x2 buffers)
    vmem_limit = int(min(64 * 2**20, max(16 * 2**20, int(resident_bytes * 1.5))))

    cost = pl.CostEstimate(
        flops=2 * n_pad * n_pad * l_pad,
        transcendentals=0,
        bytes_accessed=n_pad * n_pad * 2 + n_pad * l_pad * 2 + l_pad * 4
                       + n_pad * l_pad * 4,
    )

    call_kwargs = dict(tm=tm, n_pad=n_pad, l_pad=l_pad, grid=grid,
                       vmem_limit=vmem_limit, cost=cost)
    try:
        out_flat = _make_call(pl.Buffered(1), **call_kwargs)(adj_p, xw_p, bias_p)
        out_flat = jax.block_until_ready(out_flat)
    except Exception:
        # Fallback if single-buffer pipeline_mode is unsupported on this jax build.
        out_flat = _make_call(None, **call_kwargs)(adj_p, xw_p, bias_p)

    # (Npad, Lpad) -> (T, N, Cout).  Kept for API parity with the PyTorch module;
    # a downstream temporal layer could consume the fused (N, T*Cout) layout directly.
    out = out_flat[:N, :L].reshape(N, T, c_out).transpose(1, 0, 2)
    return out.astype(x.dtype)


def _reference_f32(x, edge_index, edge_attr, params):
    """Full-precision pure-JAX mirror of the PyTorch module (edge-scatter form)."""
    T, N, c_in = x.shape
    c_out = params["gcn_weight"].shape[1]
    w_edge = edge_attr @ params["e_weight"].T + params["e_bias"]
    src, dst = edge_index[0], edge_index[1]
    deg = jnp.zeros((N,), jnp.float32).at[src].add(1.0)
    sqrt_deg = jnp.sqrt(deg)
    ew = (sqrt_deg[src] * sqrt_deg[dst]).reshape(-1, 1) * w_edge          # (E, 1)
    xw = jnp.einsum("tnc,cd->tnd", x, params["gcn_weight"])
    msgs = ew[None, :, :] * xw[:, src, :]                                 # (T, E, Cout)
    agg = jnp.zeros((T, N, c_out), jnp.float32).at[:, dst, :].add(msgs)
    return jnp.maximum(agg + params["gcn_bias"], 0.0)


def _reference_quantized(x, edge_index, edge_attr, params, dtype):
    """Same math with A and (x @ W) rounded to `dtype` exactly as the kernel
    wrapper does (f32 accumulation) — isolates bf16 rounding from kernel bugs."""
    T, N, c_in = x.shape
    w_edge = edge_attr @ params["e_weight"].T + params["e_bias"]
    src, dst = edge_index[0], edge_index[1]
    deg = jnp.zeros((N,), jnp.float32).at[src].add(1.0)
    sqrt_deg = jnp.sqrt(deg)
    ew = (sqrt_deg[src] * sqrt_deg[dst]).reshape(-1, 1) * w_edge
    adj = jnp.zeros((N, N), jnp.float32).at[dst, src].add(ew.reshape(-1))
    adj_q = adj.astype(dtype).astype(jnp.float32)
    xw = jnp.einsum("tnc,cd->tnd", x.astype(jnp.float32),
                    params["gcn_weight"].astype(jnp.float32))
    xw_q = xw.astype(dtype).astype(jnp.float32)
    agg = jnp.einsum("vn,tnd->tvd", adj_q, xw_q)
    return jnp.maximum(agg + params["gcn_bias"], 0.0)


if __name__ == "__main__":
    key = jax.random.PRNGKey(0)
    # Small shapes; N and T*Cout chosen so both padding paths are exercised.
    T, N, c_in, c_out, E, edge_feat = 8, 20, 4, 8, 60, 3

    k = jax.random.split(key, 7)
    x = jax.random.normal(k[0], (T, N, c_in), jnp.float32)
    edge_index = jax.random.randint(k[1], (2, E), 0, N, dtype=jnp.int32)
    edge_attr = jax.random.normal(k[2], (E, edge_feat), jnp.float32)

    params = {
        # GCNConv(c_in, c_out, normalize=False): lin weight (c_in, c_out) + bias (c_out,)
        "gcn_weight": jax.random.normal(k[3], (c_in, c_out), jnp.float32) * 0.3,
        "gcn_bias": jax.random.normal(k[4], (c_out,), jnp.float32) * 0.1,
        # e_layer = nn.Linear(edge_feat_size, 1): weight (1, edge_feat), bias (1,)
        "e_weight": jax.random.normal(k[5], (1, edge_feat), jnp.float32) * 0.3,
        "e_bias": jax.random.normal(k[6], (1,), jnp.float32) * 0.1,
    }

    out = spatio_conv_layer(x, edge_index, edge_attr, params)
    out = jax.block_until_ready(out)
    assert out.shape == (T, N, c_out)

    # Tight check against a reference that rounds the inputs to bf16 exactly like
    # the kernel wrapper (verifies the fused Pallas math, mod f32 accumulation order).
    ref_q = _reference_quantized(x, edge_index, edge_attr, params, jnp.bfloat16)
    assert jnp.allclose(out, ref_q, atol=3e-3, rtol=3e-3), \
        float(jnp.max(jnp.abs(out - ref_q)))

    # Semantics check against the full-precision edge-scatter reference; tolerance
    # is the bf16 input-rounding budget.
    ref = _reference_f32(x, edge_index, edge_attr, params)
    assert jnp.allclose(out, ref, atol=1e-1, rtol=5e-2), \
        float(jnp.max(jnp.abs(out - ref)))

    print("KERNEL_OK")
</pallas_src>

<mosaic_0001>
module attributes {stable_mosaic.version = 11 : i64} {
  func.func @_spatio_conv_kernel(%arg0: i32, %arg1: memref<24x24xbf16, #tpu.memory_space<vmem>>, %arg2: memref<24x128xbf16, #tpu.memory_space<vmem>>, %arg3: memref<1x128xf32, #tpu.memory_space<vmem>>, %arg4: memref<24x128xf32, #tpu.memory_space<vmem>>) attributes {dimension_semantics = [#tpu.dimension_semantics<parallel>], iteration_bounds = array<i64: 1>, scalar_prefetch = 0 : i64, scratch_operands = 0 : i64, tpu.core_type = #tpu.core_type<tc>, window_params = [{transform_indices = @transform_0, window_bounds = array<i64: 24, 24>}, {pipeline_mode = #tpu.pipeline_mode<synchronous>, transform_indices = @transform_1, window_bounds = array<i64: 24, 128>}, {pipeline_mode = #tpu.pipeline_mode<synchronous>, transform_indices = @transform_2, window_bounds = array<i64: 1, 128>}, {transform_indices = @transform_3, window_bounds = array<i64: 24, 128>}]} {
    %c0 = arith.constant 0 : index
    %c0_0 = arith.constant 0 : index
    %0 = vector.load %arg1[%c0, %c0_0] : memref<24x24xbf16, #tpu.memory_space<vmem>>, vector<24x24xbf16>
    %c0_1 = arith.constant 0 : index
    %c0_2 = arith.constant 0 : index
    %1 = vector.load %arg2[%c0_1, %c0_2] : memref<24x128xbf16, #tpu.memory_space<vmem>>, vector<24x128xbf16>
    %cst = arith.constant dense<0.000000e+00> : vector<24x128xf32>
    %2 = tpu.matmul %0, %1, %cst {dimension_numbers = #tpu.dot_dimension_numbers<[1], [0], [0], [1], [0, 0, 1, 1], [], []>} : vector<24x24xbf16>, vector<24x128xbf16>, vector<24x128xf32> -> vector<24x128xf32>
    %c0_3 = arith.constant 0 : index
    %c0_4 = arith.constant 0 : index
    %3 = vector.load %arg3[%c0_3, %c0_4] : memref<1x128xf32, #tpu.memory_space<vmem>>, vector<1x128xf32>
    %4 = vector.broadcast %3 : vector<1x128xf32> to vector<24x128xf32>
    %5 = arith.addf %2, %4 : vector<24x128xf32>
    %cst_5 = arith.constant 0.000000e+00 : f32
    %6 = vector.broadcast %cst_5 : f32 to vector<24x128xf32>
    %7 = arith.maximumf %5, %6 : vector<24x128xf32>
    %c0_6 = arith.constant 0 : index
    %c0_7 = arith.constant 0 : index
    %8 = vector.load %arg4[%c0_6, %c0_7] : memref<24x128xf32, #tpu.memory_space<vmem>>, vector<24x128xf32>
    tpu.vector_store %arg4[%c0_6, %c0_7], %7 {strides = array<i32>} : memref<24x128xf32, #tpu.memory_space<vmem>>, vector<24x128xf32>,
    return
  }
  func.func @transform_0(%arg0: i32) -> (i32, i32) {
    %c0_i32 = arith.constant 0 : i32
    %c0_i32_0 = arith.constant 0 : i32
    return %arg0, %c0_i32 : i32, i32
  }
  func.func @transform_1(%arg0: i32) -> (i32, i32) {
    %c0_i32 = arith.constant 0 : i32
    %c0_i32_0 = arith.constant 0 : i32
    %c0_i32_1 = arith.constant 0 : i32
    return %c0_i32, %c0_i32_0 : i32, i32
  }
  func.func @transform_2(%arg0: i32) -> (i32, i32) {
    %c0_i32 = arith.constant 0 : i32
    %c0_i32_0 = arith.constant 0 : i32
    %c0_i32_1 = arith.constant 0 : i32
    return %c0_i32, %c0_i32_0 : i32, i32
  }
  func.func @transform_3(%arg0: i32) -> (i32, i32) {
    %c0_i32 = arith.constant 0 : i32
    %c0_i32_0 = arith.constant 0 : i32
    return %arg0, %c0_i32 : i32, i32
  }
}

module attributes {stable_mosaic.version = 11 : i64} {
  func.func @_spatio_conv_kernel(%arg0: i32, %arg1: memref<24x24xbf16, #tpu.memory_space<vmem>>, %arg2: memref<24x128xbf16, #tpu.memory_space<vmem>>, %arg3: memref<1x128xf32, #tpu.memory_space<vmem>>, %arg4: memref<24x128xf32, #tpu.memory_space<vmem>>) attributes {dimension_semantics = [#tpu.dimension_semantics<parallel>], iteration_bounds = array<i64: 1>, scalar_prefetch = 0 : i64, scratch_operands = 0 : i64, tpu.core_type = #tpu.core_type<tc>, window_params = [{transform_indices = @transform_0, window_bounds = array<i64: 24, 24>}, {pipeline_mode = #tpu.pipeline_mode<synchronous>, transform_indices = @transform_1, window_bounds = array<i64: 24, 128>}, {pipeline_mode = #tpu.pipeline_mode<synchronous>, transform_indices = @transform_2, window_bounds = array<i64: 1, 128>}, {transform_indices = @transform_3, window_bounds = array<i64: 24, 128>}]} {
    %c0 = arith.constant 0 : index
    %c0_0 = arith.constant 0 : index
    %0 = vector.load %arg1[%c0, %c0_0] : memref<24x24xbf16, #tpu.memory_space<vmem>>, vector<24x24xbf16>
    %c0_1 = arith.constant 0 : index
    %c0_2 = arith.constant 0 : index
    %1 = vector.load %arg2[%c0_1, %c0_2] : memref<24x128xbf16, #tpu.memory_space<vmem>>, vector<24x128xbf16>
    %cst = arith.constant dense<0.000000e+00> : vector<24x128xf32>
    %2 = tpu.matmul %0, %1, %cst {dimension_numbers = #tpu.dot_dimension_numbers<[1], [0], [0], [1], [0, 0, 1, 1], [], []>} : vector<24x24xbf16>, vector<24x128xbf16>, vector<24x128xf32> -> vector<24x128xf32>
    %c0_3 = arith.constant 0 : index
    %c0_4 = arith.constant 0 : index
    %3 = vector.load %arg3[%c0_3, %c0_4] : memref<1x128xf32, #tpu.memory_space<vmem>>, vector<1x128xf32>
    %4 = vector.broadcast %3 : vector<1x128xf32> to vector<24x128xf32>
    %5 = arith.addf %2, %4 : vector<24x128xf32>
    %cst_5 = arith.constant 0.000000e+00 : f32
    %6 = vector.broadcast %cst_5 : f32 to vector<24x128xf32>
    %7 = arith.maximumf %5, %6 : vector<24x128xf32>
    %c0_6 = arith.constant 0 : index
    %c0_7 = arith.constant 0 : index
    %8 = vector.load %arg4[%c0_6, %c0_7] : memref<24x128xf32, #tpu.memory_space<vmem>>, vector<24x128xf32>
    tpu.vector_store %arg4[%c0_6, %c0_7], %7 {strides = array<i32>} : memref<24x128xf32, #tpu.memory_space<vmem>>, vector<24x128xf32>,
    return
  }
  func.func @transform_0(%arg0: i32) -> (i32, i32) {
    %c0_i32 = arith.constant 0 : i32
    %c0_i32_0 = arith.constant 0 : i32
    return %arg0, %c0_i32 : i32, i32
  }
  func.func @transform_1(%arg0: i32) -> (i32, i32) {
    %c0_i32 = arith.constant 0 : i32
    %c0_i32_0 = arith.constant 0 : i32
    %c0_i32_1 = arith.constant 0 : i32
    return %c0_i32, %c0_i32_0 : i32, i32
  }
  func.func @transform_2(%arg0: i32) -> (i32, i32) {
    %c0_i32 = arith.constant 0 : i32
    %c0_i32_0 = arith.constant 0 : i32
    %c0_i32_1 = arith.constant 0 : i32
    return %c0_i32, %c0_i32_0 : i32, i32
  }
  func.func @transform_3(%arg0: i32) -> (i32, i32) {
    %c0_i32 = arith.constant 0 : i32
    %c0_i32_0 = arith.constant 0 : i32
    return %arg0, %c0_i32 : i32, i32
  }
}

</mosaic_0001>

<bundles_post_ra>
// kernel: tpu_custom_call.1
= control target key start
LH: loop header
LB: loop body
LE: loop exit
PB: predicated region body
PF: predicated region fallthrough
CT: control target
= control target key end

     0   :  { %8 = vsyncpa [#allocation3], 0  ;;  %s326_s0 = inlined_call_operand.hbm [shape: bf16[24,24], index: 0, kind: input, shape index: {}]   ;;  %s327_s1 = inlined_call_operand.hbm [shape: bf16[24,128], index: 1, kind: input, shape index: {}]   ;;  %s328_s2 = inlined_call_operand.vmem [shape: f32[1,128], index: 2, kind: input, shape index: {}]   ;;  %s329_s3 = inlined_call_operand.hbm [shape: f32[24,128], index: 3, kind: output, shape index: {}]  }
   0x1   :  { %9 = vsyncpa [#allocation6], 0 }
   0x2   :  { %10 = vsyncpa [#allocation4], 0  ;;  %s260_s12 = smov [#allocation2]   ;;  %s188_s16 = scalar_lea.hbm %s326_s0, 192 }
   0x3   :  { %s16_s13 = sshll.u32 %s260_s12, 4  ;;  %p189_p0 = scmp.ne.s32.totalorder %s326_s0, %s188_s16  ;;  %s17_s13 = int_to_ptr.vmem [resolvable:$true] %s16_s13 }
   0x4   :  { %p192_p1 = scmp.lt.u32.totalorder %s188_s16, %s326_s0 }
   0x6   :  { %p194_p2 = pnand %p192_p1, %p189_p0 }
   0x8   :  { %197 = shalt.err (!%p194_p2)
}
   0x9   :  { %s198_s21 = scalar_lea.vmem %s17_s13, 192  ;;  %p203_p4 = scmp.lt.s32.totalorder %s17_s13, %s17_s13 }
   0xa   :  { %p199_p3 = scmp.ne.s32.totalorder %s17_s13, %s198_s21  ;;  %p204_p5 = scmp.lt.s32.totalorder %s198_s21, %s198_s21 }
   0xc   :  { %p205_p6 = por %p204_p5, %p203_p4 }
   0xe   :  { %p206_p7 = pnand %p205_p6, %p199_p3 }
  0x10   :  { %209 = shalt.err (!%p206_p7)
}
  0x11   :  { %s261_s22 = smov 64   ;;  %s262_s23 = smov 4  }
  0x12   :  { %22 = dma.hbm_to_vmem [thread:$0]  %s326_s0, 192, %s17_s13, [#allocation3], %s261_s22, %s261_s22, %s262_s23  }
  0x13   :  { %s263_s26 = smov [#allocation5]   ;;  %s210_s30 = scalar_lea.hbm %s327_s1, 192 }
  0x14   :  { %s28_s27 = sshll.u32 %s263_s26, 4  ;;  %p211_p8 = scmp.ne.s32.totalorder %s327_s1, %s210_s30  ;;  %s29_s27 = int_to_ptr.vmem [resolvable:$true] %s28_s27 }
  0x15   :  { %p214_p9 = scmp.lt.u32.totalorder %s210_s30, %s327_s1 }
  0x17   :  { %p216_p10 = pnand %p214_p9, %p211_p8 }
  0x19   :  { %219 = shalt.err (!%p216_p10)
}
  0x1a   :  { %s220_s8 = scalar_lea.vmem %s29_s27, 192  ;;  %p225_p12 = scmp.lt.s32.totalorder %s29_s27, %s29_s27 }
  0x1b   :  { %p221_p11 = scmp.ne.s32.totalorder %s29_s27, %s220_s8  ;;  %p226_p13 = scmp.lt.s32.totalorder %s220_s8, %s220_s8 }
  0x1d   :  { %p227_p0 = por %p226_p13, %p225_p12 }
  0x1f   :  { %p228_p1 = pnand %p227_p0, %p221_p11 }
  0x21   :  { %231 = shalt.err (!%p228_p1)
}
  0x22   :  { %34 = dma.hbm_to_vmem [thread:$0]  %s327_s1, 192, %s29_s27, [#allocation6], %s261_s22, %s261_s22, %s262_s23  }
  0x23   :  { %254 = dma.done.wait [#allocation3], 192  }
  0x24   :  { %255 = vsyncadd [#allocation3], 4294967104 }
  0x25   :  { %256 = dma.done.wait [#allocation6], 192  }
  0x26   :  { %257 = vsyncadd [#allocation6], 4294967104  ;;  %vm81_vm0 = vcmask 1043456   ;;  %v184_v0 = vld [vmem:[#allocation5] sm:$0xff]   ;;  %vm74_vm1 = vcmask 195584   ;;  %v186_v2 = vld [vmem:[#allocation2] sm:$0xff]  }
  0x27   :  { %v185_v1 = vld [vmem:[#allocation5 + $0x8] ss:$0 sps:$4 sm:$0xff]   ;;  %168 = vmatprep.subr.bf16.mxu0 %v184_v0  ;;  %172 = vmatprep.mubr.msk.bf16.mxu0 %vm74_vm1, %v186_v2  ;;  %v187_v4 = vld [vmem:[#allocation2 + $0x8] ss:$0 sps:$4 sm:$0xff]   ;;  %v157_v5 = vld [vmem:[%s328_s2] ss:$0 sm:$0xff] }
  0x28   :  { %169 = vmatpush3.bf16.msra.mxu0 %v184_v0  ;;  %v83_v3 = vsel %vm81_vm0, %v185_v1, 0  ;;  %s264_s1 = smov [#allocation7]  }
  0x29   :  { %176 = vmatprep.subr.msk.bf16.mxu0 %vm81_vm0, %v185_v1  ;;  %s144_s12 = sshll.u32 %s264_s1, 4  ;;  %s145_s12 = int_to_ptr.vmem [resolvable:$true] %s144_s12 }
  0x2a   :  { %s232_s13 = scalar_lea.vmem %s145_s12, 384  ;;  %p237_p3 = scmp.lt.s32.totalorder %s145_s12, %s145_s12 }
  0x2b   :  { %p233_p2 = scmp.ne.s32.totalorder %s145_s12, %s232_s13  ;;  %p238_p4 = scmp.lt.s32.totalorder %s232_s13, %s232_s13 }
  0x2c   :  { %171 = vmatpush3.bf16.msra.mxu0 %v83_v3 }
  0x2d   :  { %p239_p5 = por %p238_p4, %p237_p3 }
  0x2f   :  { %173 = vmatmul.mubr.msk.bf16.vlgmr.msra.gmra.mrb[0].mxu0 %vm74_vm1, %v187_v4  ;;  %p240_p6 = pnand %p239_p5, %p233_p2 }
 0x102   :  { %v174_v6 = vpop.f32.mrb[0].mxu0 }
 0x103   :  { %v128_v7 = vadd.f32 %v174_v6, %v157_v5  ;;  %v119_v8 = vpop.f32.mrb[1].mxu0 }
 0x104   :  { %v120_v9 = vadd.f32 %v157_v5, %v119_v8  ;;  %v175_v10 = vpop.f32.mrb[2].mxu0 }
 0x105   :  { %v135_v11 = vmax.f32 %v128_v7, 0.0  ;;  %v122_v12 = vpop.f32.mrb[3].mxu0 }
 0x106   :  { %v133_v13 = vmax.f32 %v120_v9, 0.0  ;;  %v123_v14 = vadd.f32 %v157_v5, %v122_v12 }
 0x107   :  { %138 = vst [vmem:[#allocation7 + $0x10] sm:$0xff] %v135_v11 }
 0x108   :  { %136 = vst [vmem:[#allocation7] sm:$0xff] %v133_v13  ;;  %v134_v15 = vmax.f32 %v123_v14, 0.0 }
 0x10a   :  { %137 = vst [vmem:[#allocation7 + $0x8] sm:$0xff] %v134_v15 }
 0x10b   :  { %243 = shalt.err (!%p240_p6)
}
 0x10c   :  { %s244_s15 = scalar_lea.hbm %s329_s3, 384 }
 0x10d   :  { %p245_p7 = scmp.ne.s32.totalorder %s329_s3, %s244_s15  ;;  %p248_p8 = scmp.lt.u32.totalorder %s244_s15, %s329_s3 }
 0x10f   :  { %p250_p9 = pnand %p248_p8, %p245_p7 }
 0x111   :  { %253 = shalt.err (!%p250_p9)
}
 0x112   :  { %s265_s20 = smov 128   ;;  %s266_s21 = smov 8  }
 0x113   :  { %150 = dma.vmem_to_hbm [thread:$0]  %s145_s12, 384, %s329_s3, [#allocation4], %s265_s20, %s265_s20, %s266_s21  }
 0x114   :  { %258 = dma.done.wait [#allocation4], 384  }
 0x115   :  { %259 = vsyncadd [#allocation4], 4294966912 }
 0x116   :  { %154 = vsyncpa [#allocation3], 1 }
 0x117   :  { %155 = vsyncpa [#allocation6], 1 }
 0x118   :  { %156 = vsyncpa [#allocation4], 1 }

// kernel: tpu_custom_call.1
= control target key start
LH: loop header
LB: loop body
LE: loop exit
PB: predicated region body
PF: predicated region fallthrough
CT: control target
= control target key end

     0   :  { %8 = vsyncpa [#allocation3], 0  ;;  %s326_s0 = inlined_call_operand.hbm [shape: bf16[24,24], index: 0, kind: input, shape index: {}]   ;;  %s327_s1 = inlined_call_operand.hbm [shape: bf16[24,128], index: 1, kind: input, shape index: {}]   ;;  %s328_s2 = inlined_call_operand.vmem [shape: f32[1,128], index: 2, kind: input, shape index: {}]   ;;  %s329_s3 = inlined_call_operand.hbm [shape: f32[24,128], index: 3, kind: output, shape index: {}]  }
   0x1   :  { %9 = vsyncpa [#allocation6], 0 }
   0x2   :  { %10 = vsyncpa [#allocation4], 0  ;;  %s260_s12 = smov [#allocation2]   ;;  %s188_s16 = scalar_lea.hbm %s326_s0, 192 }
   0x3   :  { %s16_s13 = sshll.u32 %s260_s12, 4  ;;  %p189_p0 = scmp.ne.s32.totalorder %s326_s0, %s188_s16  ;;  %s17_s13 = int_to_ptr.vmem [resolvable:$true] %s16_s13 }
   0x4   :  { %p192_p1 = scmp.lt.u32.totalorder %s188_s16, %s326_s0 }
   0x6   :  { %p194_p2 = pnand %p192_p1, %p189_p0 }
   0x8   :  { %197 = shalt.err (!%p194_p2)
}
   0x9   :  { %s198_s21 = scalar_lea.vmem %s17_s13, 192  ;;  %p203_p4 = scmp.lt.s32.totalorder %s17_s13, %s17_s13 }
   0xa   :  { %p199_p3 = scmp.ne.s32.totalorder %s17_s13, %s198_s21  ;;  %p204_p5 = scmp.lt.s32.totalorder %s198_s21, %s198_s21 }
   0xc   :  { %p205_p6 = por %p204_p5, %p203_p4 }
   0xe   :  { %p206_p7 = pnand %p205_p6, %p199_p3 }
  0x10   :  { %209 = shalt.err (!%p206_p7)
}
  0x11   :  { %s261_s22 = smov 64   ;;  %s262_s23 = smov 4  }
  0x12   :  { %22 = dma.hbm_to_vmem [thread:$0]  %s326_s0, 192, %s17_s13, [#allocation3], %s261_s22, %s261_s22, %s262_s23  }
  0x13   :  { %s263_s26 = smov [#allocation5]   ;;  %s210_s30 = scalar_lea.hbm %s327_s1, 192 }
  0x14   :  { %s28_s27 = sshll.u32 %s263_s26, 4  ;;  %p211_p8 = scmp.ne.s32.totalorder %s327_s1, %s210_s30  ;;  %s29_s27 = int_to_ptr.vmem [resolvable:$true] %s28_s27 }
  0x15   :  { %p214_p9 = scmp.lt.u32.totalorder %s210_s30, %s327_s1 }
  0x17   :  { %p216_p10 = pnand %p214_p9, %p211_p8 }
  0x19   :  { %219 = shalt.err (!%p216_p10)
}
  0x1a   :  { %s220_s8 = scalar_lea.vmem %s29_s27, 192  ;;  %p225_p12 = scmp.lt.s32.totalorder %s29_s27, %s29_s27 }
  0x1b   :  { %p221_p11 = scmp.ne.s32.totalorder %s29_s27, %s220_s8  ;;  %p226_p13 = scmp.lt.s32.totalorder %s220_s8, %s220_s8 }
  0x1d   :  { %p227_p0 = por %p226_p13, %p225_p12 }
  0x1f   :  { %p228_p1 = pnand %p227_p0, %p221_p11 }
  0x21   :  { %231 = shalt.err (!%p228_p1)
}
  0x22   :  { %34 = dma.hbm_to_vmem [thread:$0]  %s327_s1, 192, %s29_s27, [#allocation6], %s261_s22, %s261_s22, %s262_s23  }
  0x23   :  { %254 = dma.done.wait [#allocation3], 192  }
  0x24   :  { %255 = vsyncadd [#allocation3], 4294967104 }
  0x25   :  { %256 = dma.done.wait [#allocation6], 192  }
  0x26   :  { %257 = vsyncadd [#allocation6], 4294967104  ;;  %vm81_vm0 = vcmask 1043456   ;;  %v184_v0 = vld [vmem:[#allocation5] sm:$0xff]   ;;  %vm74_vm1 = vcmask 195584   ;;  %v186_v2 = vld [vmem:[#allocation2] sm:$0xff]  }
  0x27   :  { %v185_v1 = vld [vmem:[#allocation5 + $0x8] ss:$0 sps:$4 sm:$0xff]   ;;  %168 = vmatprep.subr.bf16.mxu0 %v184_v0  ;;  %172 = vmatprep.mubr.msk.bf16.mxu0 %vm74_vm1, %v186_v2  ;;  %v187_v4 = vld [vmem:[#allocation2 + $0x8] ss:$0 sps:$4 sm:$0xff]   ;;  %v157_v5 = vld [vmem:[%s328_s2] ss:$0 sm:$0xff] }
  0x28   :  { %169 = vmatpush3.bf16.msra.mxu0 %v184_v0  ;;  %v83_v3 = vsel %vm81_vm0, %v185_v1, 0  ;;  %s264_s1 = smov [#allocation7]  }
  0x29   :  { %176 = vmatprep.subr.msk.bf16.mxu0 %vm81_vm0, %v185_v1  ;;  %s144_s12 = sshll.u32 %s264_s1, 4  ;;  %s145_s12 = int_to_ptr.vmem [resolvable:$true] %s144_s12 }
  0x2a   :  { %s232_s13 = scalar_lea.vmem %s145_s12, 384  ;;  %p237_p3 = scmp.lt.s32.totalorder %s145_s12, %s145_s12 }
  0x2b   :  { %p233_p2 = scmp.ne.s32.totalorder %s145_s12, %s232_s13  ;;  %p238_p4 = scmp.lt.s32.totalorder %s232_s13, %s232_s13 }
  0x2c   :  { %171 = vmatpush3.bf16.msra.mxu0 %v83_v3 }
  0x2d   :  { %p239_p5 = por %p238_p4, %p237_p3 }
  0x2f   :  { %173 = vmatmul.mubr.msk.bf16.vlgmr.msra.gmra.mrb[0].mxu0 %vm74_vm1, %v187_v4  ;;  %p240_p6 = pnand %p239_p5, %p233_p2 }
 0x102   :  { %v174_v6 = vpop.f32.mrb[0].mxu0 }
 0x103   :  { %v128_v7 = vadd.f32 %v174_v6, %v157_v5  ;;  %v119_v8 = vpop.f32.mrb[1].mxu0 }
 0x104   :  { %v120_v9 = vadd.f32 %v157_v5, %v119_v8  ;;  %v175_v10 = vpop.f32.mrb[2].mxu0 }
 0x105   :  { %v135_v11 = vmax.f32 %v128_v7, 0.0  ;;  %v122_v12 = vpop.f32.mrb[3].mxu0 }
 0x106   :  { %v133_v13 = vmax.f32 %v120_v9, 0.0  ;;  %v123_v14 = vadd.f32 %v157_v5, %v122_v12 }
 0x107   :  { %138 = vst [vmem:[#allocation7 + $0x10] sm:$0xff] %v135_v11 }
 0x108   :  { %136 = vst [vmem:[#allocation7] sm:$0xff] %v133_v13  ;;  %v134_v15 = vmax.f32 %v123_v14, 0.0 }
 0x10a   :  { %137 = vst [vmem:[#allocation7 + $0x8] sm:$0xff] %v134_v15 }
 0x10b   :  { %243 = shalt.err (!%p240_p6)
}
 0x10c   :  { %s244_s15 = scalar_lea.hbm %s329_s3, 384 }
 0x10d   :  { %p245_p7 = scmp.ne.s32.totalorder %s329_s3, %s244_s15  ;;  %p248_p8 = scmp.lt.u32.totalorder %s244_s15, %s329_s3 }
 0x10f   :  { %p250_p9 = pnand %p248_p8, %p245_p7 }
 0x111   :  { %253 = shalt.err (!%p250_p9)
}
 0x112   :  { %s265_s20 = smov 128   ;;  %s266_s21 = smov 8  }
 0x113   :  { %150 = dma.vmem_to_hbm [thread:$0]  %s145_s12, 384, %s329_s3, [#allocation4], %s265_s20, %s265_s20, %s266_s21  }
 0x114   :  { %258 = dma.done.wait [#allocation4], 384  }
 0x115   :  { %259 = vsyncadd [#allocation4], 4294966912 }
 0x116   :  { %154 = vsyncpa [#allocation3], 1 }
 0x117   :  { %155 = vsyncpa [#allocation6], 1 }
 0x118   :  { %156 = vsyncpa [#allocation4], 1 }

</bundles_post_ra>
